<compile_context>
chip_gen: v6e
topology: v6e:2x2x1
jax: 0.10.0
libtpu: 0.0.40
codegen_flags: <defaults>
</compile_context>

<pallas_src>
import jax
import jax.numpy as jnp
import numpy as np
from jax.experimental import pallas as pl
from jax.experimental.pallas import tpu as pltpu

# ----- scaled-down hyper-parameters (stand-ins for 768 / 512 / 1600 / 20 / 15) -----
B = 2            # batch
H = 32           # BERT hidden size        (orig 768)
D = 32           # fusion / attention dim  (orig 512)
MM = 64          # Block fusion mm_dim     (orig 1600)
CHUNKS = 4       # Block fusion chunks     (orig 20)
RANK = 3         # Block fusion rank       (orig 15)
CHUNK = MM // CHUNKS
NUM_CLASSES = 4

RC = RANK * CHUNK            # per-chunk inner width
NRC = CHUNKS * RC            # total block-diagonal width
LANE = 128                   # lane-tile width
DPAD = ((D + LANE - 1) // LANE) * LANE                    # 128-aligned slot for the attn block
OUT_PAD = ((max(D, NUM_CLASSES) + LANE - 1) // LANE) * LANE   # lane-dense output width
FRONT_W = OUT_PAD + DPAD + MM    # width of the fused front-end weight
SLAB_W = 5 * LANE                # [s_sum | gtt | gt | w_l1 | w_last], 128-lane slots
NB = 8                           # bias-pack rows (sublane aligned)
BW = max(OUT_PAD, NRC, MM, D)    # bias-pack width

WEIGHT_DTYPE = jnp.bfloat16      # perf review: halve weight DMA bytes (f32 also works)


def head_kernel(x_ref, w_front_ref, w_m01_ref, slab_ref, bias_ref, out_ref):
    f32 = jnp.float32
    x = x_ref[...]                                        # (2B, H): rows 0:B text, B:2B entity

    # One MXU push serves fc1 (text head), the folded fc2->Attention weight and
    # the folded fc2->linear0 weight (all slices start on 128-lane boundaries).
    y = jnp.dot(x, w_front_ref[...].astype(f32), preferred_element_type=f32)   # (2B, FRONT_W)

    text_out = y[:B, :OUT_PAD] + bias_ref[0:1, :OUT_PAD]                        # lane-padded
    # Attention(D, 'general') with a length-1 context: softmax == 1, so
    # attn = tanh(entity_out @ (W_out_top + W_in @ W_out_bot)) — already folded
    # (together with fc2) into w_front host-side.
    attn_out = jnp.tanh(y[B:, OUT_PAD:OUT_PAD + D] + bias_ref[1:2, :D])
    x0 = y[B:, OUT_PAD + DPAD:OUT_PAD + DPAD + MM] + bias_ref[2:3, :MM]

    w_l1 = slab_ref[:D, 3 * LANE:3 * LANE + MM].astype(f32)
    x1 = jnp.dot(attn_out, w_l1, preferred_element_type=f32) + bias_ref[3:4, :MM]

    # Block fusion: block-diagonal matmuls replace the per-chunk Python loop;
    # a stacked-identity matmul does the rank-sum so z stays lane-dense.
    w_m0 = w_m01_ref[0].astype(f32)
    w_m1 = w_m01_ref[1].astype(f32)
    m0 = jnp.dot(x0, w_m0, preferred_element_type=f32) + bias_ref[4:5, :NRC]
    m1 = jnp.dot(x1, w_m1, preferred_element_type=f32) + bias_ref[5:6, :NRC]
    m = m0 * m1                                                           # (B, NRC)
    s_sum = slab_ref[:, 0:MM].astype(f32)                                 # (NRC, MM)
    z = jnp.dot(m, s_sum, preferred_element_type=f32)                     # (B, MM)

    # Signed sqrt + per-chunk L2 normalisation (rsqrt routes to the EUP).
    z_mag = jnp.sqrt(jnp.abs(z))
    z = jnp.where(z < 0, -z_mag, z_mag)
    gtt = slab_ref[:MM, LANE:LANE + CHUNKS].astype(f32)                   # (MM, CHUNKS)
    gt = slab_ref[:CHUNKS, 2 * LANE:2 * LANE + MM].astype(f32)            # (CHUNKS, MM)
    chunk_ss = jnp.dot(z * z, gtt, preferred_element_type=f32)            # (B, CHUNKS)
    inv = jax.lax.rsqrt(jnp.maximum(chunk_ss, 1e-24))
    z = z * jnp.dot(inv, gt, preferred_element_type=f32)

    # linear_out and fc3 folded host-side into one weight (dropout == identity).
    w_last = slab_ref[:MM, 4 * LANE:4 * LANE + OUT_PAD].astype(f32)       # (MM, OUT_PAD)
    logits = jax.nn.relu(
        jnp.dot(z, w_last, preferred_element_type=f32) + bias_ref[6:7, :OUT_PAD])

    # Single lane-dense output slab: row 0 = padded logits, row 1 = padded text_out.
    out_ref[0, :, :] = logits
    out_ref[1, :, :] = text_out


def init_params(key):
    """Raw (PyTorch-layout) parameters, weights pre-transposed to (in, out)."""
    ks = jax.random.split(key, 16)
    s = 0.05
    p = {
        "w_fc1": s * jax.random.normal(ks[0], (H, D), jnp.float32),
        "b_fc1": s * jax.random.normal(ks[1], (1, D), jnp.float32),
        "w_fc2": s * jax.random.normal(ks[2], (H, D), jnp.float32),
        "b_fc2": s * jax.random.normal(ks[3], (1, D), jnp.float32),
        "w_ain": s * jax.random.normal(ks[4], (D, D), jnp.float32),       # Attention.linear_in (no bias)
        "w_aout": s * jax.random.normal(ks[5], (2 * D, D), jnp.float32),  # Attention.linear_out (no bias)
        "w_l0": s * jax.random.normal(ks[6], (D, MM), jnp.float32),
        "b_l0": s * jax.random.normal(ks[7], (1, MM), jnp.float32),
        "w_l1": s * jax.random.normal(ks[8], (D, MM), jnp.float32),
        "b_l1": s * jax.random.normal(ks[9], (1, MM), jnp.float32),
        "w_m0": s * jax.random.normal(ks[10], (CHUNKS, CHUNK, RC), jnp.float32),
        "b_m0": s * jax.random.normal(ks[11], (CHUNKS, 1, RC), jnp.float32),
        "w_m1": s * jax.random.normal(ks[12], (CHUNKS, CHUNK, RC), jnp.float32),
        "b_m1": s * jax.random.normal(ks[13], (CHUNKS, 1, RC), jnp.float32),
        "w_lo": s * jax.random.normal(ks[14], (MM, D), jnp.float32),
        "b_lo": s * jax.random.normal(ks[15], (1, D), jnp.float32),
        "w_fc3": s * jax.random.normal(jax.random.fold_in(key, 100), (D, NUM_CLASSES), jnp.float32),
        "b_fc3": s * jax.random.normal(jax.random.fold_in(key, 101), (1, NUM_CLASSES), jnp.float32),
    }
    return p


def pack_params(p, weight_dtype=WEIGHT_DTYPE):
    """One-time host-side weight folding / packing (inference-time)."""
    f32 = np.float32
    asn = lambda k: np.asarray(p[k], f32)

    w_fc1, b_fc1 = asn("w_fc1"), asn("b_fc1").reshape(-1)
    w_fc2, b_fc2 = asn("w_fc2"), asn("b_fc2").reshape(1, -1)
    w_ain, w_aout = asn("w_ain"), asn("w_aout")
    w_l0, b_l0 = asn("w_l0"), asn("b_l0").reshape(-1)
    w_l1, b_l1 = asn("w_l1"), asn("b_l1").reshape(-1)
    w_lo, b_lo = asn("w_lo"), asn("b_lo").reshape(1, -1)
    w_fc3, b_fc3 = asn("w_fc3"), asn("b_fc3").reshape(1, -1)

    # Fold the degenerate Attention block (softmax over length-1 context == 1).
    w_attn = w_aout[:D] + w_ain @ w_aout[D:]                  # (D, D)
    # Fold fc2 into everything entity_out feeds (it has no other consumer).
    w_ent_attn = w_fc2 @ w_attn                               # (H, D)
    w_ent_l0 = w_fc2 @ w_l0                                   # (H, MM)
    b_attn = (b_fc2 @ w_attn).reshape(-1)                     # (D,)
    b_x0 = (b_fc2 @ w_l0).reshape(-1) + b_l0                  # (MM,)

    # Front-end weight: [fc1 (lane-padded) | folded attn | pad | folded l0].
    w_front = np.zeros((H, FRONT_W), f32)
    w_front[:, :D] = w_fc1
    w_front[:, OUT_PAD:OUT_PAD + D] = w_ent_attn
    w_front[:, OUT_PAD + DPAD:OUT_PAD + DPAD + MM] = w_ent_l0

    # Fold linear_out @ fc3 (dropout identity, no nonlinearity in between).
    w_last = np.zeros((MM, OUT_PAD), f32)
    w_last[:, :NUM_CLASSES] = w_lo @ w_fc3
    b_last = np.zeros(OUT_PAD, f32)
    b_last[:NUM_CLASSES] = (b_lo @ w_fc3 + b_fc3).reshape(-1)

    # Block-diagonal fusion weights stacked into one 3-D array (single DMA).
    # TODO(synk): at production sizes keep these as (CHUNKS, CHUNK, RC) blocks and
    #             grid over CHUNKS instead of densifying (see header TODO).
    w_m0_raw, w_m1_raw = asn("w_m0"), asn("w_m1")
    w_m01 = np.zeros((2, MM, NRC), f32)
    for c in range(CHUNKS):
        rs = slice(c * CHUNK, (c + 1) * CHUNK)
        cs = slice(c * RC, (c + 1) * RC)
        w_m01[0, rs, cs] = w_m0_raw[c]
        w_m01[1, rs, cs] = w_m1_raw[c]

    # Rank-sum matrix (block-diagonal stacked identities) + chunk indicators.
    s_sum = np.zeros((NRC, MM), f32)
    eye_c = np.eye(CHUNK, dtype=f32)
    for c in range(CHUNKS):
        for r in range(RANK):
            rows = slice(c * RC + r * CHUNK, c * RC + (r + 1) * CHUNK)
            s_sum[rows, c * CHUNK:(c + 1) * CHUNK] = eye_c
    gt = np.kron(np.eye(CHUNKS, dtype=f32), np.ones((1, CHUNK), f32))     # (CHUNKS, MM)
    gtt = np.ascontiguousarray(gt.T)                                      # (MM, CHUNKS)

    # Constant slab: every remaining matrix at a 128-lane offset -> one DMA.
    slab = np.zeros((NRC, SLAB_W), f32)
    slab[:NRC, 0:MM] = s_sum
    slab[:MM, LANE:LANE + CHUNKS] = gtt
    slab[:CHUNKS, 2 * LANE:2 * LANE + MM] = gt
    slab[:D, 3 * LANE:3 * LANE + MM] = w_l1
    slab[:MM, 4 * LANE:4 * LANE + OUT_PAD] = w_last

    # All biases in one f32 array (one DMA, cheap sublane-row reads).
    biases = np.zeros((NB, BW), f32)
    biases[0, :D] = b_fc1
    biases[1, :D] = b_attn
    biases[2, :MM] = b_x0
    biases[3, :MM] = b_l1
    biases[4, :NRC] = asn("b_m0").reshape(-1)
    biases[5, :NRC] = asn("b_m1").reshape(-1)
    biases[6, :OUT_PAD] = b_last

    return {
        "w_front": jnp.asarray(w_front, dtype=weight_dtype),
        "w_m01": jnp.asarray(w_m01, dtype=weight_dtype),
        "slab": jnp.asarray(slab, dtype=weight_dtype),    # 0/1 entries stay exact in bf16
        "biases": jnp.asarray(biases, dtype=jnp.float32),
    }


def _vmem_limit_bytes(args, out_shape):
    """Right-sized scoped-VMEM request (review: don't ask for all of v7x's 64 MiB)."""
    total = sum(int(np.prod(a.shape)) * jnp.dtype(a.dtype).itemsize for a in args)
    total += int(np.prod(out_shape.shape)) * jnp.dtype(out_shape.dtype).itemsize
    return int(min(48 * 2**20, max(8 * 2**20, 2 * total + 4 * 2**20)))


@jax.jit
def bert_classifier_update_head(pooled_text, pooled_entity, packed, img=None):
    """Pallas implementation of BertClassifier_Update.forward (post-backbone)."""
    del img  # the value of vit(img) is never used in the reference forward
    # Sublane-stack the two pooled vectors so one MXU push serves both heads
    # (layout plumbing only; at B=2 both use <8 MXU rows anyway).
    x = jnp.concatenate([pooled_text, pooled_entity], axis=0)          # (2B, H)
    args = (x, packed["w_front"], packed["w_m01"], packed["slab"], packed["biases"])
    out_shape = jax.ShapeDtypeStruct((2, B, OUT_PAD), jnp.float32)
    out = pl.pallas_call(
        head_kernel,
        out_shape=out_shape,
        in_specs=[pl.BlockSpec(memory_space=pltpu.MemorySpace.VMEM)] * len(args),
        out_specs=pl.BlockSpec(memory_space=pltpu.MemorySpace.VMEM),
        compiler_params=pltpu.CompilerParams(
            vmem_limit_bytes=_vmem_limit_bytes(args, out_shape)),
    )(*args)
    logits = out[0, :, :NUM_CLASSES]
    text_out = out[1, :, :D]
    return logits, text_out


def reference_head(pooled_text, pooled_entity, p):
    """Pure-JAX reference mirroring the PyTorch forward (for verification)."""
    text_out = pooled_text @ p["w_fc1"] + p["b_fc1"]
    entity_out = pooled_entity @ p["w_fc2"] + p["b_fc2"]
    q = entity_out @ p["w_ain"]
    mix = entity_out  # softmax over a single context element -> weight 1
    attn_out = jnp.tanh(jnp.concatenate([mix, q], -1) @ p["w_aout"])
    x0 = entity_out @ p["w_l0"] + p["b_l0"]
    x1 = attn_out @ p["w_l1"] + p["b_l1"]
    zs = []
    for c in range(CHUNKS):
        m0 = x0[:, c * CHUNK:(c + 1) * CHUNK] @ p["w_m0"][c] + p["b_m0"][c]
        m1 = x1[:, c * CHUNK:(c + 1) * CHUNK] @ p["w_m1"][c] + p["b_m1"][c]
        m = (m0 * m1).reshape(B, RANK, CHUNK)
        z = m.sum(axis=1)
        z = jnp.sqrt(jax.nn.relu(z)) - jnp.sqrt(jax.nn.relu(-z))
        z = z / jnp.maximum(jnp.linalg.norm(z, axis=-1, keepdims=True), 1e-12)
        zs.append(z)
    fused = jnp.concatenate(zs, -1) @ p["w_lo"] + p["b_lo"]
    logits = jax.nn.relu(fused @ p["w_fc3"] + p["b_fc3"])
    return logits, text_out


if __name__ == "__main__":
    key = jax.random.PRNGKey(0)
    k_text, k_ent, k_img, k_param = jax.random.split(key, 4)

    # Stand-ins for the BERT pooled outputs; img kept only for signature parity.
    pooled_text = jax.random.normal(k_text, (B, H), jnp.float32)
    pooled_entity = jax.random.normal(k_ent, (B, H), jnp.float32)
    img = jax.random.normal(k_img, (B, 3, 16, 16), jnp.float32)  # NCHW, unused

    params = init_params(k_param)
    packed = pack_params(params)   # one-time host-side folding/packing

    logits, text_out = bert_classifier_update_head(pooled_text, pooled_entity, packed, img)
    logits = jax.block_until_ready(logits)
    text_out = jax.block_until_ready(text_out)

    ref_logits, ref_text_out = reference_head(pooled_text, pooled_entity, params)
    # bf16 weight quantization (per perf review) costs ~0.2-1% relative error;
    # with WEIGHT_DTYPE = jnp.float32 the 2e-3 tolerance is recovered.
    tol = 2e-3 if WEIGHT_DTYPE == jnp.float32 else 2e-2
    np.testing.assert_allclose(np.asarray(logits), np.asarray(ref_logits),
                               rtol=tol, atol=tol)
    np.testing.assert_allclose(np.asarray(text_out), np.asarray(ref_text_out),
                               rtol=tol, atol=tol)

    print("KERNEL_OK")
</pallas_src>

<mosaic_0001>
module attributes {stable_mosaic.version = 11 : i64} {
  func.func @head_kernel(%arg0: memref<4x32xf32, #tpu.memory_space<vmem>>, %arg1: memref<32x320xbf16, #tpu.memory_space<vmem>>, %arg2: memref<2x64x192xbf16, #tpu.memory_space<vmem>>, %arg3: memref<192x640xbf16, #tpu.memory_space<vmem>>, %arg4: memref<8x192xf32, #tpu.memory_space<vmem>>, %arg5: memref<2x2x128xf32, #tpu.memory_space<vmem>>) attributes {dimension_semantics = [], scalar_prefetch = 0 : i64, scratch_operands = 0 : i64, tpu.core_type = #tpu.core_type<tc>} {
    %c0 = arith.constant 0 : index
    %c0_0 = arith.constant 0 : index
    %0 = vector.load %arg0[%c0, %c0_0] : memref<4x32xf32, #tpu.memory_space<vmem>>, vector<4x32xf32>
    %c0_1 = arith.constant 0 : index
    %c0_2 = arith.constant 0 : index
    %1 = vector.load %arg1[%c0_1, %c0_2] : memref<32x320xbf16, #tpu.memory_space<vmem>>, vector<32x320xbf16>
    %2 = arith.extf %1 : vector<32x320xbf16> to vector<32x320xf32>
    %cst = arith.constant dense<0.000000e+00> : vector<4x320xf32>
    %3 = tpu.matmul %0, %2, %cst {dimension_numbers = #tpu.dot_dimension_numbers<[1], [0], [0], [1], [0, 0, 1, 1], [], []>} : vector<4x32xf32>, vector<32x320xf32>, vector<4x320xf32> -> vector<4x320xf32>
    %4 = vector.extract_strided_slice %3 {offsets = [0, 0], sizes = [2, 128], strides = [1, 1]} : vector<4x320xf32> to vector<2x128xf32>
    %c0_3 = arith.constant 0 : index
    %c0_4 = arith.constant 0 : index
    %5 = vector.load %arg4[%c0_3, %c0_4] : memref<8x192xf32, #tpu.memory_space<vmem>>, vector<1x128xf32>
    %6 = vector.broadcast %5 : vector<1x128xf32> to vector<2x128xf32>
    %7 = arith.addf %4, %6 : vector<2x128xf32>
    %8 = vector.extract_strided_slice %3 {offsets = [2, 128], sizes = [2, 32], strides = [1, 1]} : vector<4x320xf32> to vector<2x32xf32>
    %c1 = arith.constant 1 : index
    %c0_5 = arith.constant 0 : index
    %9 = vector.load %arg4[%c1, %c0_5] : memref<8x192xf32, #tpu.memory_space<vmem>>, vector<1x32xf32>
    %10 = vector.broadcast %9 : vector<1x32xf32> to vector<2x32xf32>
    %11 = arith.addf %8, %10 : vector<2x32xf32>
    %12 = math.tanh %11 : vector<2x32xf32>
    %13 = vector.extract_strided_slice %3 {offsets = [2, 256], sizes = [2, 64], strides = [1, 1]} : vector<4x320xf32> to vector<2x64xf32>
    %c2 = arith.constant 2 : index
    %c0_6 = arith.constant 0 : index
    %14 = vector.load %arg4[%c2, %c0_6] : memref<8x192xf32, #tpu.memory_space<vmem>>, vector<1x64xf32>
    %15 = vector.broadcast %14 : vector<1x64xf32> to vector<2x64xf32>
    %16 = arith.addf %13, %15 : vector<2x64xf32>
    %c0_7 = arith.constant 0 : index
    %c384 = arith.constant 384 : index
    %17 = vector.load %arg3[%c0_7, %c384] : memref<192x640xbf16, #tpu.memory_space<vmem>>, vector<32x64xbf16>
    %18 = arith.extf %17 : vector<32x64xbf16> to vector<32x64xf32>
    %cst_8 = arith.constant dense<0.000000e+00> : vector<2x64xf32>
    %19 = tpu.matmul %12, %18, %cst_8 {dimension_numbers = #tpu.dot_dimension_numbers<[1], [0], [0], [1], [0, 0, 1, 1], [], []>} : vector<2x32xf32>, vector<32x64xf32>, vector<2x64xf32> -> vector<2x64xf32>
    %c3 = arith.constant 3 : index
    %c0_9 = arith.constant 0 : index
    %20 = vector.load %arg4[%c3, %c0_9] : memref<8x192xf32, #tpu.memory_space<vmem>>, vector<1x64xf32>
    %21 = vector.broadcast %20 : vector<1x64xf32> to vector<2x64xf32>
    %22 = arith.addf %19, %21 : vector<2x64xf32>
    %c0_10 = arith.constant 0 : index
    %c0_11 = arith.constant 0 : index
    %c0_12 = arith.constant 0 : index
    %23 = vector.load %arg2[%c0_10, %c0_11, %c0_12] : memref<2x64x192xbf16, #tpu.memory_space<vmem>>, vector<1x64x192xbf16>
    %24 = vector.shape_cast %23 : vector<1x64x192xbf16> to vector<64x192xbf16>
    %25 = arith.extf %24 : vector<64x192xbf16> to vector<64x192xf32>
    %c1_13 = arith.constant 1 : index
    %c0_14 = arith.constant 0 : index
    %c0_15 = arith.constant 0 : index
    %26 = vector.load %arg2[%c1_13, %c0_14, %c0_15] : memref<2x64x192xbf16, #tpu.memory_space<vmem>>, vector<1x64x192xbf16>
    %27 = vector.shape_cast %26 : vector<1x64x192xbf16> to vector<64x192xbf16>
    %28 = arith.extf %27 : vector<64x192xbf16> to vector<64x192xf32>
    %cst_16 = arith.constant dense<0.000000e+00> : vector<2x192xf32>
    %29 = tpu.matmul %16, %25, %cst_16 {dimension_numbers = #tpu.dot_dimension_numbers<[1], [0], [0], [1], [0, 0, 1, 1], [], []>} : vector<2x64xf32>, vector<64x192xf32>, vector<2x192xf32> -> vector<2x192xf32>
    %c4 = arith.constant 4 : index
    %c0_17 = arith.constant 0 : index
    %30 = vector.load %arg4[%c4, %c0_17] : memref<8x192xf32, #tpu.memory_space<vmem>>, vector<1x192xf32>
    %31 = vector.broadcast %30 : vector<1x192xf32> to vector<2x192xf32>
    %32 = arith.addf %29, %31 : vector<2x192xf32>
    %cst_18 = arith.constant dense<0.000000e+00> : vector<2x192xf32>
    %33 = tpu.matmul %22, %28, %cst_18 {dimension_numbers = #tpu.dot_dimension_numbers<[1], [0], [0], [1], [0, 0, 1, 1], [], []>} : vector<2x64xf32>, vector<64x192xf32>, vector<2x192xf32> -> vector<2x192xf32>
    %c5 = arith.constant 5 : index
    %c0_19 = arith.constant 0 : index
    %34 = vector.load %arg4[%c5, %c0_19] : memref<8x192xf32, #tpu.memory_space<vmem>>, vector<1x192xf32>
    %35 = vector.broadcast %34 : vector<1x192xf32> to vector<2x192xf32>
    %36 = arith.addf %33, %35 : vector<2x192xf32>
    %37 = arith.mulf %32, %36 : vector<2x192xf32>
    %c0_20 = arith.constant 0 : index
    %c0_21 = arith.constant 0 : index
    %38 = vector.load %arg3[%c0_20, %c0_21] : memref<192x640xbf16, #tpu.memory_space<vmem>>, vector<192x64xbf16>
    %39 = arith.extf %38 : vector<192x64xbf16> to vector<192x64xf32>
    %cst_22 = arith.constant dense<0.000000e+00> : vector<2x64xf32>
    %40 = tpu.matmul %37, %39, %cst_22 {dimension_numbers = #tpu.dot_dimension_numbers<[1], [0], [0], [1], [0, 0, 1, 1], [], []>} : vector<2x192xf32>, vector<192x64xf32>, vector<2x64xf32> -> vector<2x64xf32>
    %41 = math.absf %40 : vector<2x64xf32>
    %42 = math.sqrt %41 : vector<2x64xf32>
    %cst_23 = arith.constant 0.000000e+00 : f32
    %43 = vector.broadcast %cst_23 : f32 to vector<2x64xf32>
    %44 = arith.cmpf olt, %40, %43 : vector<2x64xf32>
    %cst_24 = arith.constant 0.000000e+00 : f32
    %45 = vector.broadcast %cst_24 : f32 to vector<2x64xf32>
    %46 = arith.subf %45, %42 : vector<2x64xf32>
    %47 = arith.select %44, %46, %42 : vector<2x64xi1>, vector<2x64xf32>
    %c0_25 = arith.constant 0 : index
    %c128 = arith.constant 128 : index
    %48 = vector.load %arg3[%c0_25, %c128] : memref<192x640xbf16, #tpu.memory_space<vmem>>, vector<64x4xbf16>
    %49 = arith.extf %48 : vector<64x4xbf16> to vector<64x4xf32>
    %c0_26 = arith.constant 0 : index
    %c256 = arith.constant 256 : index
    %50 = vector.load %arg3[%c0_26, %c256] : memref<192x640xbf16, #tpu.memory_space<vmem>>, vector<4x64xbf16>
    %51 = arith.extf %50 : vector<4x64xbf16> to vector<4x64xf32>
    %52 = arith.mulf %47, %47 : vector<2x64xf32>
    %cst_27 = arith.constant dense<0.000000e+00> : vector<2x4xf32>
    %53 = tpu.matmul %52, %49, %cst_27 {dimension_numbers = #tpu.dot_dimension_numbers<[1], [0], [0], [1], [0, 0, 1, 1], [], []>} : vector<2x64xf32>, vector<64x4xf32>, vector<2x4xf32> -> vector<2x4xf32>
    %cst_28 = arith.constant 1.000000e-24 : f32
    %54 = vector.broadcast %cst_28 : f32 to vector<2x4xf32>
    %55 = arith.maximumf %53, %54 : vector<2x4xf32>
    %56 = math.rsqrt %55 : vector<2x4xf32>
    %cst_29 = arith.constant dense<0.000000e+00> : vector<2x64xf32>
    %57 = tpu.matmul %56, %51, %cst_29 {dimension_numbers = #tpu.dot_dimension_numbers<[1], [0], [0], [1], [0, 0, 1, 1], [], []>} : vector<2x4xf32>, vector<4x64xf32>, vector<2x64xf32> -> vector<2x64xf32>
    %58 = arith.mulf %47, %57 : vector<2x64xf32>
    %c0_30 = arith.constant 0 : index
    %c512 = arith.constant 512 : index
    %59 = vector.load %arg3[%c0_30, %c512] : memref<192x640xbf16, #tpu.memory_space<vmem>>, vector<64x128xbf16>
    %60 = arith.extf %59 : vector<64x128xbf16> to vector<64x128xf32>
    %cst_31 = arith.constant dense<0.000000e+00> : vector<2x128xf32>
    %61 = tpu.matmul %58, %60, %cst_31 {dimension_numbers = #tpu.dot_dimension_numbers<[1], [0], [0], [1], [0, 0, 1, 1], [], []>} : vector<2x64xf32>, vector<64x128xf32>, vector<2x128xf32> -> vector<2x128xf32>
    %c6 = arith.constant 6 : index
    %c0_32 = arith.constant 0 : index
    %62 = vector.load %arg4[%c6, %c0_32] : memref<8x192xf32, #tpu.memory_space<vmem>>, vector<1x128xf32>
    %63 = vector.broadcast %62 : vector<1x128xf32> to vector<2x128xf32>
    %64 = arith.addf %61, %63 : vector<2x128xf32>
    %cst_33 = arith.constant 0.000000e+00 : f32
    %65 = vector.broadcast %cst_33 : f32 to vector<2x128xf32>
    %66 = arith.maximumf %64, %65 : vector<2x128xf32>
    %c0_34 = arith.constant 0 : index
    %c0_35 = arith.constant 0 : index
    %c0_36 = arith.constant 0 : index
    %67 = vector.load %arg5[%c0_34, %c0_35, %c0_36] : memref<2x2x128xf32, #tpu.memory_space<vmem>>, vector<1x2x128xf32>
    %68 = vector.shape_cast %67 : vector<1x2x128xf32> to vector<2x128xf32>
    %69 = vector.shape_cast %66 : vector<2x128xf32> to vector<1x2x128xf32>
    tpu.vector_store %arg5[%c0_34, %c0_35, %c0_36], %69 {strides = array<i32>} : memref<2x2x128xf32, #tpu.memory_space<vmem>>, vector<1x2x128xf32>,
    %c1_37 = arith.constant 1 : index
    %c0_38 = arith.constant 0 : index
    %c0_39 = arith.constant 0 : index
    %70 = vector.load %arg5[%c1_37, %c0_38, %c0_39] : memref<2x2x128xf32, #tpu.memory_space<vmem>>, vector<1x2x128xf32>
    %71 = vector.shape_cast %70 : vector<1x2x128xf32> to vector<2x128xf32>
    %72 = vector.shape_cast %7 : vector<2x128xf32> to vector<1x2x128xf32>
    tpu.vector_store %arg5[%c1_37, %c0_38, %c0_39], %72 {strides = array<i32>} : memref<2x2x128xf32, #tpu.memory_space<vmem>>, vector<1x2x128xf32>,
    return
  }
}

</mosaic_0001>

<bundles_post_ra>
// kernel: bert_classifier_update_head.1
= control target key start
LH: loop header
LB: loop body
LE: loop exit
PB: predicated region body
PF: predicated region fallthrough
CT: control target
= control target key end

     0   :  { %10 = vsyncpa [#allocation3], 0  ;;  %s1345_s0 = inlined_call_operand.vmem [shape: f32[4,32], index: 0, kind: input, shape index: {}]   ;;  %s1346_s1 = inlined_call_operand.hbm [shape: bf16[32,320], index: 1, kind: input, shape index: {}]   ;;  %s1347_s2 = inlined_call_operand.hbm [shape: bf16[2,64,192], index: 2, kind: input, shape index: {}]   ;;  %s1348_s3 = inlined_call_operand.hbm [shape: bf16[192,640], index: 3, kind: input, shape index: {}]   ;;  %s1349_s4 = inlined_call_operand.hbm [shape: f32[8,192], index: 4, kind: input, shape index: {}]   ;;  %s1350_s5 = inlined_call_operand.vmem [shape: f32[2,2,128], index: 5, kind: output, shape index: {}]  }
   0x1   :  { %11 = vsyncpa [#allocation5], 0 }
   0x2   :  { %12 = vsyncpa [#allocation8], 0  ;;  %s1172_s18 = smov [#allocation4]  }
   0x3   :  { %s32_s19 = sshll.u32 %s1172_s18, 4  ;;  %s33_s19 = int_to_ptr.vmem [resolvable:$true] %s32_s19 }
   0x4   :  { %s1094_s20 = scalar_lea.vmem %s33_s19, 2048  ;;  %p1099_p1 = scmp.lt.s32.totalorder %s33_s19, %s33_s19 }
   0x5   :  { %p1095_p0 = scmp.ne.s32.totalorder %s33_s19, %s1094_s20  ;;  %p1100_p2 = scmp.lt.s32.totalorder %s1094_s20, %s1094_s20 }
   0x7   :  { %p1101_p3 = por %p1100_p2, %p1099_p1 }
   0x9   :  { %p1102_p4 = pnand %p1101_p3, %p1095_p0 }
   0xb   :  { %1105 = shalt.err (!%p1102_p4)
}
   0xc   :  { %s1173_s21 = smov 128   ;;  %s1174_s22 = smov 8  }
   0xd   :  { %38 = dma.hbm_to_vmem [thread:$0]  %s1347_s2, 2048, %s33_s19, [#allocation5], %s1173_s21, %s1173_s21, %s1174_s22  }
   0xe   :  { %s1175_s25 = smov [#allocation2]  }
   0xf   :  { %s20_s26 = sshll.u32 %s1175_s25, 4  ;;  %s21_s26 = int_to_ptr.vmem [resolvable:$true] %s20_s26 }
  0x10   :  { %s1114_s27 = scalar_lea.vmem %s21_s26, 768  ;;  %p1119_p6 = scmp.lt.s32.totalorder %s21_s26, %s21_s26 }
  0x11   :  { %p1115_p5 = scmp.ne.s32.totalorder %s21_s26, %s1114_s27  ;;  %p1120_p7 = scmp.lt.s32.totalorder %s1114_s27, %s1114_s27 }
  0x13   :  { %p1121_p8 = por %p1120_p7, %p1119_p6 }
  0x15   :  { %p1122_p9 = pnand %p1121_p8, %p1115_p5 }
  0x17   :  { %1125 = shalt.err (!%p1122_p9)
}
  0x18   :  { %s1176_s28 = smov 192   ;;  %s1177_s29 = smov 12  }
  0x19   :  { %26 = dma.hbm_to_vmem [thread:$0]  %s1346_s1, 768, %s21_s26, [#allocation3], %s1176_s28, %s1176_s28, %s1177_s29  }
  0x1a   :  { %s1178_s7 = smov [#allocation6]  }
  0x1b   :  { %s44_s8 = sshll.u32 %s1178_s7, 4  ;;  %s45_s8 = int_to_ptr.vmem [resolvable:$true] %s44_s8 }
  0x1c   :  { %s1134_s2 = scalar_lea.vmem %s45_s8, 7680  ;;  %p1139_p11 = scmp.lt.s32.totalorder %s45_s8, %s45_s8 }
  0x1d   :  { %p1135_p10 = scmp.ne.s32.totalorder %s45_s8, %s1134_s2  ;;  %p1140_p12 = scmp.lt.s32.totalorder %s1134_s2, %s1134_s2 }
  0x1f   :  { %p1141_p13 = por %p1140_p12, %p1139_p11 }
  0x21   :  { %p1142_p0 = pnand %p1141_p13, %p1135_p10 }
  0x23   :  { %1145 = shalt.err (!%p1142_p0)
}
  0x24   :  { %s1179_s9 = smov 320   ;;  %s1180_s10 = smov 20  }
  0x25   :  { %50 = dma.hbm_to_vmem [thread:$0]  %s1348_s3, 7680, %s45_s8, [#allocation5], %s1179_s9, %s1179_s9, %s1180_s10  }
  0x26   :  { %s1181_s13 = smov [#allocation7]  }
  0x27   :  { %s57_s14 = sshll.u32 %s1181_s13, 4  ;;  %s58_s14 = int_to_ptr.vmem [resolvable:$true] %s57_s14 }
  0x28   :  { %s1154_s1 = scalar_lea.vmem %s58_s14, 256  ;;  %p1159_p2 = scmp.lt.s32.totalorder %s58_s14, %s58_s14 }
  0x29   :  { %p1155_p1 = scmp.ne.s32.totalorder %s58_s14, %s1154_s1  ;;  %p1160_p3 = scmp.lt.s32.totalorder %s1154_s1, %s1154_s1 }
  0x2b   :  { %p1161_p4 = por %p1160_p3, %p1159_p2 }
  0x2d   :  { %p1162_p5 = pnand %p1161_p4, %p1155_p1 }
  0x2f   :  { %1165 = shalt.err (!%p1162_p5)
}
  0x30   :  { %60 = dma.hbm_to_vmem [thread:$0]  %s1349_s4, 256, %s58_s14, [#allocation8]  }
  0x31   :  { %1166 = dma.done.wait [#allocation3], 768  }
  0x32   :  { %1167 = vsyncadd [#allocation3], 4294966528 }
  0x33   :  { %1168 = dma.done.wait [#allocation5], 9728  }
  0x34   :  { %1169 = vsyncadd [#allocation5], 4294957568 }
  0x35   :  { %1170 = dma.done.wait [#allocation8], 256  }
  0x36   :  { %1171 = vsyncadd [#allocation8], 4294967040  ;;  %v1182_v0 = vmov 0.0   ;;  %v80_v1 = vld [vmem:[#allocation2 + $0x24] sm:$0xff]  ;;  %v78_v2 = vld [vmem:[#allocation2 + $0x18] sm:$0xff]  ;;  %vm94_vm0 = vcmask 261120  }
  0x37   :  { %162 = vmatprep.mubr.f32.mxu0 %v1182_v0  ;;  %1003 = vmatprep.subr.mxu1 %v1182_v0  ;;  %v76_v3 = vld [vmem:[#allocation2 + $0xc] sm:$0xff]  ;;  %v92_v4 = vunpack.c.h.bf16 %v80_v1  ;;  %v91_v5 = vunpack.c.l.bf16 %v80_v1  ;;  %v89_v6 = vunpack.c.h.bf16 %v78_v2  ;;  %v88_v7 = vunpack.c.l.bf16 %v78_v2  ;;  %v74_v8 = vld [vmem:[#allocation2] sm:$0xff]  ;;  %v77_v17 = vld [vmem:[#allocation2 + $0x8] ss:$12 sps:$4 sm:$0xff]  }
  0x38   :  { %v86_v9 = vunpack.c.h.bf16 %v76_v3  ;;  %v85_v10 = vunpack.c.l.bf16 %v76_v3  ;;  %v83_v11 = vunpack.c.h.bf16 %v74_v8  ;;  %v82_v12 = vunpack.c.l.bf16 %v74_v8  ;;  %v73_v13 = vld [vmem:[%s1345_s0] sm:$0xf]  ;;  %v249_v18 = vld [vmem:[#allocation6 + $0x34] ss:$20 sps:$4 sm:$0xff]   ;;  %v247_v23 = vld [vmem:[#allocation6 + $0xc] ss:$20 sps:$4 sm:$0xff]  }
  0x39   :  { %122 = vmatprep.subr.mxu0 %v92_v4  ;;  %v81_v14 = vld [vmem:[#allocation2 + $0x20] ss:$12 sps:$4 sm:$0xff]   ;;  %v87_v19 = vunpack.c.h.bf16 %v77_v17  ;;  %v253_v20 = vunpack.c.h.bf16 %v249_v18  ;;  %v84_v21 = vunpack.c.l.bf16 %v77_v17  ;;  %v252_v22 = vunpack.c.l.bf16 %v249_v18  ;;  %v334_v32 = vld [vmem:[#allocation4 + $0x28] sm:$0xff]  ;;  %v333_v36 = vld [vmem:[#allocation4 + $0x20] sm:$0xff] }
  0x3a   :  { %123 = vmatpush1.msra.mxu0 %v91_v5  ;;  %v93_v15 = vunpack.c.h.bf16 %v81_v14  ;;  %v90_v16 = vunpack.c.l.bf16 %v81_v14  ;;  %vm1183_vm1 = vmmov 0   ;;  %v251_v24 = vunpack.c.h.bf16 %v247_v23  ;;  %v336_v26 = vld [vmem:[#allocation4 + $0x38] sm:$0xff]  ;;  %v335_v27 = vld [vmem:[#allocation4 + $0x30] sm:$0xff]  ;;  %v330_v46 = vld [vmem:[#allocation4 + $0x8] sm:$0xff] }
  0x3b   :  { %124 = vmatprep.subr.mxu0 %v89_v6  ;;  %1011 = vmatprep.mubr.msk.f32.mxu1 %vm1183_vm1, %v1182_v0  ;;  %v250_v25 = vunpack.c.l.bf16 %v247_v23  ;;  %v361_v28 = vld [vmem:[#allocation4 + $0x78] sm:$0xff]  ;;  %v351_v29 = vunpack.c.l.bf16 %v336_v26  ;;  %v352_v30 = vunpack.c.h.bf16 %v336_v26  ;;  %v350_v31 = vunpack.c.h.bf16 %v335_v27  ;;  %v331_v42 = vld [vmem:[#allocation4 + $0x10] sm:$0xff]  ;;  %v329_v47 = vld [vmem:[#allocation4] sm:$0xff] }
  0x3c   :  { %125 = vmatpush1.msra.mxu0 %v88_v7  ;;  %1004 = vmatpush3.msra.mxu1 %v93_v15  ;;  %v349_v33 = vunpack.c.l.bf16 %v335_v27  ;;  %v377_v34 = vunpack.c.h.bf16 %v361_v28  ;;  %v348_v35 = vunpack.c.h.bf16 %v334_v32  ;;  %v347_v37 = vunpack.c.l.bf16 %v334_v32  ;;  %v332_v39 = vld [vmem:[#allocation4 + $0x18] sm:$0xff]  ;;  %v239_v52 = vld [vmem:[#allocation7] ss:$0 sm:$0xff]  ;;  %v241_v54 = vld [vmem:[#allocation7 + $0x1] ss:$0 sm:$0xff] }
  0x3d   :  { %126 = vmatprep.subr.mxu0 %v86_v9  ;;  %1005 = vmatprep.subr.mxu1 %v1182_v0  ;;  %v346_v38 = vunpack.c.h.bf16 %v333_v36  ;;  %v345_v40 = vunpack.c.l.bf16 %v333_v36  ;;  %v344_v41 = vunpack.c.h.bf16 %v332_v39  ;;  %v343_v43 = vunpack.c.l.bf16 %v332_v39  ;;  %v360_v58 = vld [vmem:[#allocation4 + $0x70] sm:$0xff]  ;;  %v359_v61 = vld [vmem:[#allocation4 + $0x68] sm:$0xff]  ;;  %v358_v2 = vld [vmem:[#allocation4 + $0x60] sm:$0xff] }
  0x3e   :  { %127 = vmatpush1.msra.mxu0 %v85_v10  ;;  %1006 = vmatpush3.msra.mxu1 %v90_v16  ;;  %v342_v44 = vunpack.c.h.bf16 %v331_v42  ;;  %v341_v45 = vunpack.c.l.bf16 %v331_v42  ;;  %v339_v48 = vunpack.c.l.bf16 %v330_v46  ;;  %v340_v49 = vunpack.c.h.bf16 %v330_v46  ;;  %v357_v5 = vld [vmem:[#allocation4 + $0x58] sm:$0xff]  ;;  %v356_v8 = vld [vmem:[#allocation4 + $0x50] sm:$0xff]  ;;  %v244_v16 = vld [vmem:[#allocation7 + $0x2] ss:$0 sm:$0xff] }
  0x3f   :  { %128 = vmatprep.subr.mxu0 %v83_v11  ;;  %1007 = vmatprep.subr.mxu1 %v1182_v0  ;;  %v337_v50 = vunpack.c.l.bf16 %v329_v47  ;;  %v338_v51 = vunpack.c.h.bf16 %v329_v47  ;;  %v376_v60 = vunpack.c.l.bf16 %v361_v28  ;;  %v375_v63 = vunpack.c.h.bf16 %v360_v58  ;;  %v355_v11 = vld [vmem:[#allocation4 + $0x48] sm:$0xff]  ;;  %v1272_v42 = vld [vmem:[#allocation6 + $0x50] sm:$0xff]  }
  0x40   :  { %129 = vmatpush1.msra.mxu0 %v82_v12  ;;  %1008 = vmatpush3.msra.mxu1 %v87_v19  ;;  %v374_v1 = vunpack.c.l.bf16 %v360_v58  ;;  %v373_v3 = vunpack.c.h.bf16 %v359_v61  ;;  %v372_v4 = vunpack.c.l.bf16 %v359_v61  ;;  %v371_v6 = vunpack.c.h.bf16 %v358_v2  ;;  %v565_v32 = vld [vmem:[#allocation6 + $0xb4] ss:$280 sps:$4 sm:$0xff]  }
  0x41   :  { %962 = vmatmul.mubr.msk.f32.vlgmr.msra.gmra.mxu0 %vm94_vm0, %v73_v13  ;;  %1014 = vmatprep.subr.mxu0 %v1182_v0  ;;  %v370_v7 = vunpack.c.l.bf16 %v358_v2  ;;  %v369_v9 = vunpack.c.h.bf16 %v357_v5  ;;  %v368_v10 = vunpack.c.l.bf16 %v357_v5  ;;  %v367_v12 = vunpack.c.h.bf16 %v356_v8  ;;  %v1260_v36 = vld [vmem:[#allocation6 + $0x8c] sm:$0xff]  }
  0x42   :  { %1015 = vmatpush3.msra.mxu0 %v253_v20  ;;  %1009 = vmatprep.subr.mxu1 %v1182_v0  ;;  %v365_v14 = vunpack.c.h.bf16 %v355_v11  ;;  %v364_v15 = vunpack.c.l.bf16 %v355_v11  ;;  %v354_v20 = vld [vmem:[#allocation4 + $0x40] sm:$0xff]  ;;  %vm393_vm2 = vcmask 523264   ;;  %v587_v39 = vunpack.c.l.bf16 %v1260_v36  ;;  %v1280_v46 = vld [vmem:[#allocation6 + $0x28] sm:$0xff]  }
  0x43   :  { %1016 = vmatprep.subr.mxu0 %v1182_v0  ;;  %1010 = vmatpush3.msra.mxu1 %v84_v21  ;;  %v362_v23 = vunpack.c.l.bf16 %v354_v20  ;;  %v468_v11 = vld [vmem:[#allocation7 + $0x5] ss:$8 sm:$0x3]  ;;  %vm786_vm6 = vcmask 1043456   ;;  %vm782_vm7 = vcmask 31744  }
  0x44   :  { %1017 = vmatpush3.msra.mxu0 %v252_v22  ;;  %1012 = vmatmul.mubr.msk.f32.vlgmr.msra.gmra.mxu1 %vm94_vm0, %v73_v13  ;;  %v366_v13 = vunpack.c.l.bf16 %v356_v8  ;;  %v363_v22 = vunpack.c.h.bf16 %v354_v20  ;;  %v379_v8 = vld [vmem:[#allocation7 + $0x4] ss:$8 sm:$0x3] }
  0x45   :  { %1018 = vmatprep.subr.mxu0 %v1182_v0  ;;  %1022 = vmatprep.mubr.msk.f32.mxu0 %vm1183_vm1, %v1182_v0 }
  0x46   :  { %1019 = vmatpush3.msra.mxu0 %v251_v24  ;;  %460 = vmatprep.mubr.f32.mxu1 %v1182_v0  ;;  %v571_v24 = vld [vmem:[#allocation6 + $0x118] ss:$20 sps:$4 sm:$0xff]  }
  0x47   :  { %1020 = vmatprep.subr.mxu0 %v1182_v0  ;;  %412 = vmatprep.subr.mxu1 %v352_v30  ;;  %v595_v26 = vunpack.c.h.bf16 %v571_v24  ;;  %v594_v27 = vunpack.c.l.bf16 %v571_v24 }
  0x48   :  { %1021 = vmatpush3.msra.mxu0 %v250_v25  ;;  %413 = vmatpush1.msra.mxu1 %v351_v29  ;;  %v569_v25 = vld [vmem:[#allocation6 + $0xf0] ss:$20 sps:$4 sm:$0xff]   ;;  %v567_v29 = vld [vmem:[#allocation6 + $0xc8] ss:$20 sps:$4 sm:$0xff]  }
  0x49   :  { %499 = vmatprep.subr.mxu0 %v377_v34  ;;  %414 = vmatprep.subr.mxu1 %v350_v31  ;;  %v593_v28 = vunpack.c.h.bf16 %v569_v25  ;;  %v592_v30 = vunpack.c.l.bf16 %v569_v25  ;;  %v591_v31 = vunpack.c.h.bf16 %v567_v29  ;;  %v1257_v34 = vld [vmem:[#allocation6 + $0x9c] sm:$0xff]  }
  0x4a   :  { %415 = vmatpush1.msra.mxu1 %v349_v33  ;;  %v590_v33 = vunpack.c.l.bf16 %v567_v29  ;;  %v700_v29 = vunpack.c.h.bf16 %v1272_v42 }
  0x4b   :  { %416 = vmatprep.subr.mxu1 %v348_v35  ;;  %v589_v35 = vunpack.c.l.bf16 %v565_v32 }
  0x4c   :  { %417 = vmatpush1.msra.mxu1 %v347_v37  ;;  %v588_v37 = vunpack.c.h.bf16 %v1257_v34 }
  0x4d   :  { %418 = vmatprep.subr.mxu1 %v346_v38  ;;  %v1264_v38 = vld [vmem:[#allocation6 + $0x78] sm:$0xff]  }
  0x4e   :  { %419 = vmatpush1.msra.mxu1 %v345_v40  ;;  %v1268_v40 = vld [vmem:[#allocation6 + $0x64] sm:$0xff]  }
  0x4f   :  { %420 = vmatprep.subr.mxu1 %v344_v41  ;;  %v586_v41 = vunpack.c.l.bf16 %v1264_v38 }
  0x50   :  { %421 = vmatpush1.msra.mxu1 %v343_v43  ;;  %v585_v43 = vunpack.c.l.bf16 %v1268_v40 }
  0x51   :  { %422 = vmatprep.subr.mxu1 %v342_v44  ;;  %v1276_v44 = vld [vmem:[#allocation6 + $0x3c] sm:$0xff]  }
  0x52   :  { %423 = vmatpush1.msra.mxu1 %v341_v45  ;;  %v584_v45 = vunpack.c.l.bf16 %v1272_v42  ;;  %v583_v47 = vunpack.c.l.bf16 %v1276_v44 }
  0x53   :  { %424 = vmatprep.subr.mxu1 %v340_v49  ;;  %v582_v49 = vunpack.c.l.bf16 %v1280_v46 }
  0x54   :  { %425 = vmatpush1.msra.mxu1 %v339_v48  ;;  %v1284_v48 = vld [vmem:[#allocation6 + $0x14] sm:$0xff]  }
  0x55   :  { %426 = vmatprep.subr.mxu1 %v338_v51  ;;  %v581_v51 = vunpack.c.l.bf16 %v1284_v48 }
  0x56   :  { %427 = vmatpush1.msra.mxu1 %v337_v50  ;;  %v1288_v50 = vld [vmem:[#allocation6] sm:$0xff]  }
  0x57   :  { %607 = vmatprep.subr.mxu1 %v1182_v0 }
 0x101   :  { %v164_v53 = vpop.f32.mrf.mxu0 }
 0x102   :  { %v240_v55 = vadd.f32 %v239_v52, %v164_v53  ;;  %v580_v52 = vunpack.c.l.bf16 %v1288_v50  ;;  %v578_v53 = vld [vmem:[#allocation6 + $0x1a4] ss:$20 sps:$4 sm:$0xff]  }
 0x103   :  { %v166_v56 = vpop.f32.mrf.mxu0 }
 0x104   :  { %972 = vst [vmem:[%s1350_s5 + $0x2] sm:$0x3] %v240_v55  ;;  %v242_v57 = vadd.f32 %v241_v54, %v166_v56  ;;  %v235_v17 = vpop.f32.mrf.mxu1  ;;  %v603_v54 = vunpack.c.h.bf16 %v565_v32  ;;  %v602_v55 = vunpack.c.h.bf16 %v578_v53  ;;  %v601_v56 = vunpack.c.l.bf16 %v578_v53 }
 0x105   :  { %v245_v18 = vadd.f32 %v244_v16, %v235_v17  ;;  %v697_v32 = vunpack.c.h.bf16 %v1284_v48 }
 0x106   :  { %1080 = vtanh.f32 %v242_v57  ;;  %v1013_v19 = vpop.f32.mrf.mxu1  ;;  %v576_v57 = vld [vmem:[#allocation6 + $0x17c] ss:$20 sps:$4 sm:$0xff]  }
 0x107   :  { %v392_v21 = vrot.slane %v245_v18, 2  ;;  %v600_v58 = vunpack.c.h.bf16 %v576_v57 }
 0x109   :  { %965 = vmatmul.mubr.msk.f32.vlgmr.msra.gmra.mxu1 %vm393_vm2, %v392_v21 }
 0x10a   :  { %608 = vmatpush1.msra.mxu1 %v595_v26  ;;  %v703_v26 = vunpack.c.h.bf16 %v1260_v36 }
 0x10b   :  { %609 = vmatprep.subr.mxu1 %v1182_v0 }
 0x10c   :  { %610 = vmatpush1.msra.mxu1 %v594_v27  ;;  %v702_v27 = vunpack.c.h.bf16 %v1264_v38 }
 0x10d   :  { %611 = vmatprep.subr.mxu1 %v1182_v0 }
 0x10e   :  { %612 = vmatpush1.msra.mxu1 %v593_v28  ;;  %v701_v28 = vunpack.c.h.bf16 %v1268_v40 }
 0x10f   :  { %613 = vmatprep.subr.mxu1 %v1182_v0 }
 0x110   :  { %614 = vmatpush1.msra.mxu1 %v592_v30  ;;  %v699_v30 = vunpack.c.h.bf16 %v1276_v44 }
 0x111   :  { %615 = vmatprep.subr.mxu1 %v1182_v0 }
 0x112   :  { %616 = vmatpush1.msra.mxu1 %v591_v31  ;;  %v698_v31 = vunpack.c.h.bf16 %v1280_v46  ;;  %v704_v46 = vld [vmem:[#allocation6 + $0x8] sm:$0x3] }
 0x113   :  { %v1081_v59 = vpop.eup %1080  ;;  %617 = vmatprep.subr.mxu1 %v1182_v0 }
 0x114   :  { %v256_v62 = vrot.slane %v1081_v59, 2  ;;  %618 = vmatpush1.msra.mxu1 %v590_v33  ;;  %v254_v59 = vld [vmem:[#allocation7 + $0x3] ss:$0 sm:$0xff]  ;;  %v696_v33 = vunpack.c.h.bf16 %v1288_v50 }
 0x115   :  { %619 = vmatprep.subr.mxu1 %v1182_v0 }
 0x116   :  { %1023 = vmatmul.mubr.msk.f32.vlgmr.msra.gmra.mxu0 %vm94_vm0, %v256_v62  ;;  %620 = vmatpush1.msra.mxu1 %v589_v35 }
 0x117   :  { %500 = vmatpush1.msra.mxu0 %v376_v60  ;;  %547 = vmatprep.mubr.f32.mxu0 %v1182_v0 }
 0x118   :  { %501 = vmatprep.subr.mxu0 %v375_v63  ;;  %621 = vmatprep.subr.mxu1 %v1182_v0  ;;  %v599_v63 = vunpack.c.l.bf16 %v576_v57 }
 0x119   :  { %502 = vmatpush1.msra.mxu0 %v374_v1  ;;  %622 = vmatpush1.msra.mxu1 %v588_v37  ;;  %v574_v1 = vld [vmem:[#allocation6 + $0x154] ss:$20 sps:$4 sm:$0xff]  }
 0x11a   :  { %503 = vmatprep.subr.mxu0 %v373_v3  ;;  %623 = vmatprep.subr.mxu1 %v1182_v0  ;;  %v598_v2 = vunpack.c.h.bf16 %v574_v1  ;;  %v597_v3 = vunpack.c.l.bf16 %v574_v1 }
 0x11b   :  { %504 = vmatpush1.msra.mxu0 %v372_v4  ;;  %624 = vmatpush1.msra.mxu1 %v587_v39  ;;  %v1305_v4 = vld [vmem:[#allocation6 + $0x88] ss:$184 sps:$4 sm:$0xff]  }
 0x11c   :  { %505 = vmatprep.subr.mxu0 %v371_v6  ;;  %625 = vmatprep.subr.mxu1 %v1182_v0  ;;  %v596_v5 = vunpack.c.h.bf16 %v1305_v4  ;;  %v381_v6 = vlaneseq }
 0x11d   :  { %506 = vmatpush1.msra.mxu0 %v370_v7  ;;  %626 = vmatpush1.msra.mxu1 %v586_v41 }
 0x11e   :  { %507 = vmatprep.subr.mxu0 %v369_v9  ;;  %627 = vmatprep.subr.mxu1 %v1182_v0  ;;  %v382_v7 = vshrl.u32 %v381_v6, 7 }
 0x11f   :  { %508 = vmatpush1.msra.mxu0 %v368_v10  ;;  %628 = vmatpush1.msra.mxu1 %v585_v43 }
 0x120   :  { %509 = vmatprep.subr.mxu0 %v367_v12  ;;  %629 = vmatprep.subr.mxu1 %v1182_v0  ;;  %v383_v9 = vsub.s32 0, %v382_v7  ;;  %v387_v10 = vsub.s32 1, %v382_v7 }
 0x121   :  { %510 = vmatpush1.msra.mxu0 %v366_v13  ;;  %630 = vmatpush1.msra.mxu1 %v584_v45 }
 0x122   :  { %511 = vmatprep.subr.mxu0 %v365_v14  ;;  %631 = vmatprep.subr.mxu1 %v1182_v0  ;;  %v384_v13 = vrot.slane %v379_v8, %v383_v9  ;;  %v473_v14 = vrot.slane %v468_v11, %v383_v9  ;;  %v477_v16 = vrot.slane %v468_v11, %v387_v10 }
 0x123   :  { %512 = vmatpush1.msra.mxu0 %v364_v15  ;;  %632 = vmatpush1.msra.mxu1 %v583_v47  ;;  %v388_v15 = vrot.slane %v379_v8, %v387_v10  ;;  %v705_v47 = vunpack.c.l.bf16 %v704_v46 }
 0x124   :  { %513 = vmatprep.subr.mxu0 %v363_v22  ;;  %633 = vmatprep.subr.mxu1 %v1182_v0 }
 0x125   :  { %514 = vmatpush1.msra.mxu0 %v362_v23  ;;  %634 = vmatpush1.msra.mxu1 %v582_v49 }
 0x126   :  { %1025 = vmatprep.subr.mxu0 %v1182_v0  ;;  %635 = vmatprep.subr.mxu1 %v1182_v0 }
 0x127   :  { %636 = vmatpush1.msra.mxu1 %v581_v51  ;;  %v876_v51 = vunpack.c.l.bf16 %v1257_v34 }
 0x128   :  { %637 = vmatprep.subr.mxu1 %v1182_v0 }
 0x129   :  { %638 = vmatpush1.msra.mxu1 %v580_v52  ;;  %v866_v52 = vld [vmem:[#allocation6 + $0x60] ss:$20 sps:$4 sm:$0xff]  }
 0x12a   :  { %655 = vmatprep.subr.mxu1 %v1182_v0  ;;  %v873_v57 = vunpack.c.l.bf16 %v866_v52 }
 0x12b   :  { %656 = vmatpush2.msra.mxu1 %v603_v54  ;;  %v875_v54 = vunpack.c.l.bf16 %v1305_v4 }
 0x12c   :  { %657 = vmatprep.subr.mxu1 %v1182_v0 }
 0x12d   :  { %658 = vmatpush2.msra.mxu1 %v602_v55  ;;  %v874_v55 = vunpack.c.h.bf16 %v866_v52 }
 0x12e   :  { %659 = vmatprep.subr.mxu1 %v1182_v0 }
 0x12f   :  { %660 = vmatpush2.msra.mxu1 %v601_v56  ;;  %v864_v56 = vld [vmem:[#allocation6 + $0x38] ss:$20 sps:$4 sm:$0xff]  }
 0x130   :  { %661 = vmatprep.subr.mxu1 %v1182_v0  ;;  %v871_v34 = vunpack.c.l.bf16 %v864_v56 }
 0x131   :  { %662 = vmatpush2.msra.mxu1 %v600_v58  ;;  %v872_v58 = vunpack.c.h.bf16 %v864_v56 }
 0x132   :  { %663 = vmatprep.subr.mxu1 %v1182_v0 }
 0x133   :  { %664 = vmatpush2.msra.mxu1 %v599_v63 }
 0x134   :  { %665 = vmatprep.subr.mxu1 %v1182_v0 }
 0x135   :  { %666 = vmatpush2.msra.mxu1 %v598_v2  ;;  %v877_v2 = vld [vmem:[#allocation7 + $0x6] ss:$0 sm:$0xff] }
 0x136   :  { %667 = vmatprep.subr.mxu1 %v1182_v0 }
 0x137   :  { %668 = vmatpush2.msra.mxu1 %v597_v3 }
 0x138   :  { %669 = vmatprep.subr.mxu1 %v1182_v0 }
 0x139   :  { %670 = vmatpush2.msra.mxu1 %v596_v5 }
 0x1c9   :  { %v462_v12 = vpop.f32.mrf.mxu1 }
 0x1ca   :  { %v463_v19 = vadd.f32 %v462_v12, %v384_v13 }
 0x1cb   :  { %v464_v17 = vpop.f32.mrf.mxu1 }
 0x1cc   :  { %v465_v22 = vadd.f32 %v464_v17, %v388_v15 }
 0x1d6   :  { %v325_v60 = vpop.f32.mrf.mxu0 }
 0x1d7   :  { %v326_v61 = vadd.f32 %v325_v60, %v254_v59  ;;  %v862_v59 = vld [vmem:[#allocation6 + $0x10] ss:$20 sps:$4 sm:$0xff]  }
 0x1d8   :  { %v1024_v62 = vpop.f32.mrf.mxu0  ;;  %v870_v60 = vunpack.c.h.bf16 %v862_v59 }
 0x1d9   :  { %966 = vmatmul.mubr.msk.f32.vlgmr.msra.gmra.mxu0 %vm393_vm2, %v326_v61  ;;  %v869_v61 = vunpack.c.l.bf16 %v862_v59 }
 0x1da   :  { %1041 = vmatprep.mubr.msk.f32.mxu0 %vm1183_vm1, %v1182_v0  ;;  %1026 = vmatpush3.msra.mxu0 %v703_v26 }
 0x1db   :  { %1027 = vmatprep.subr.mxu0 %v1182_v0 }
 0x1dc   :  { %1028 = vmatpush3.msra.mxu0 %v702_v27 }
 0x1dd   :  { %1029 = vmatprep.subr.mxu0 %v1182_v0 }
 0x1de   :  { %1030 = vmatpush3.msra.mxu0 %v701_v28 }
 0x1df   :  { %1031 = vmatprep.subr.mxu0 %v1182_v0 }
 0x1e0   :  { %1032 = vmatpush3.msra.mxu0 %v700_v29 }
 0x1e1   :  { %1033 = vmatprep.subr.mxu0 %v1182_v0 }
 0x1e2   :  { %1034 = vmatpush3.msra.mxu0 %v699_v30 }
 0x1e3   :  { %1035 = vmatprep.subr.mxu0 %v1182_v0 }
 0x1e4   :  { %1036 = vmatpush3.msra.mxu0 %v698_v31 }
 0x1e5   :  { %1037 = vmatprep.subr.mxu0 %v1182_v0 }
 0x1e6   :  { %1038 = vmatpush3.msra.mxu0 %v697_v32 }
 0x1e7   :  { %1039 = vmatprep.subr.mxu0 %v1182_v0 }
 0x1e8   :  { %1040 = vmatpush3.msra.mxu0 %v696_v33 }
 0x1e9   :  { %1044 = vmatprep.subr.mxu0 %v1182_v0 }
 0x299   :  { %v549_v18 = vpop.f32.mrf.mxu0 }
 0x29a   :  { %v550_v20 = vadd.f32 %v549_v18, %v473_v14 }
 0x29b   :  { %v551_v21 = vpop.f32.mrf.mxu0 }
 0x29c   :  { %v552_v23 = vadd.f32 %v551_v21, %v477_v16  ;;  %v554_v25 = vmul.f32 %v550_v20, %v463_v19 }
 0x29e   :  { %v555_v24 = vmul.f32 %v552_v23, %v465_v22 }
 0x2a0   :  { %967 = vmatprep.mubr.msk.f32.mxu1 %vm393_vm2, %v555_v24 }
 0x2a1   :  { %672 = vmatmul.mubr.f32.vlgmr.msra.gmra.mxu1 %v554_v25 }
 0x361   :  { %v673_v35 = vpop.f32.mrf.mxu1 }
 0x362   :  { %v677_v36 = vand.u32 2147483647, %v673_v35  ;;  %vm685_vm5 = vcmp.lt.f32.partialorder %v673_v35, 0.0 }
 0x363   :  { %v675_v37 = vpop.f32.mrf.mxu1 }
 0x364   :  { %1082 = vrsqrt.f32 %v677_v36  ;;  %vm680_vm3 = vcmp.eq.f32.partialorder %v677_v36, inf  ;;  %v683_v40 = vand.u32 2147483648, %v677_v36  ;;  %vm682_vm4 = vcmp.eq.f32.partialorder %v677_v36, 0.0 }
 0x371   :  { %v1083_v38 = vpop.eup %1082 }
 0x372   :  { %v679_v39 = vmul.f32 %v1083_v38, %v677_v36 }
 0x374   :  { %v681_v41 = vsel %vm680_vm3, %v677_v36, %v679_v39 }
 0x375   :  { %v684_v42 = vsel %vm682_vm4, %v683_v40, %v681_v41 }
 0x376   :  { %v686_v43 = vsub.f32 0.0, %v684_v42 }
 0x378   :  { %v687_v44 = vsel %vm685_vm5, %v686_v43, %v684_v42 }
 0x379   :  { %v706_v45 = vmul.f32 %v687_v44, %v687_v44 }
 0x37b   :  { %1042 = vmatmul.mubr.msk.f32.vlgmr.msra.gmra.mxu0 %vm393_vm2, %v706_v45 }
 0x37c   :  { %1046 = vmatprep.mubr.msk.f32.mxu0 %vm1183_vm1, %v1182_v0  ;;  %1045 = vmatpush3.msk.msra.mxu0 %vm786_vm6, %v705_v47 }
 0x37d   :  { %1049 = vmatprep.subr.mxu0 %v1182_v0 }
 0x43b   :  { %v776_v48 = vpop.f32.mrf.mxu0 }
 0x43c   :  { %v780_v49 = vmax.f32 %v776_v48, 1e-24 }
 0x43d   :  { %v1043_v50 = vpop.f32.mrf.mxu0 }
 0x43e   :  { %1084 = vrsqrt.f32 %v780_v49 }
 0x44b   :  { %v1085_v53 = vpop.eup %1084 }
 0x44c   :  { %1047 = vmatmul.mubr.msk.f32.vlgmr.msra.gmra.mxu0 %vm782_vm7, %v1085_v53 }
 0x44d   :  { %1050 = vmatpush3.msra.mxu0 %v876_v51  ;;  %1065 = vmatprep.mubr.msk.f32.mxu0 %vm1183_vm1, %v1182_v0 }
 0x44e   :  { %1051 = vmatprep.subr.mxu0 %v1182_v0 }
 0x44f   :  { %1052 = vmatpush3.msra.mxu0 %v875_v54 }
 0x450   :  { %1053 = vmatprep.subr.mxu0 %v1182_v0 }
 0x451   :  { %1054 = vmatpush3.msra.mxu0 %v874_v55 }
 0x452   :  { %1055 = vmatprep.subr.mxu0 %v1182_v0 }
 0x453   :  { %1056 = vmatpush3.msra.mxu0 %v873_v57 }
 0x454   :  { %1057 = vmatprep.subr.mxu0 %v1182_v0 }
 0x455   :  { %1058 = vmatpush3.msra.mxu0 %v872_v58 }
 0x456   :  { %1059 = vmatprep.subr.mxu0 %v1182_v0 }
 0x457   :  { %1060 = vmatpush3.msra.mxu0 %v871_v34 }
 0x458   :  { %1061 = vmatprep.subr.mxu0 %v1182_v0 }
 0x459   :  { %1062 = vmatpush3.msra.mxu0 %v870_v60 }
 0x45a   :  { %1063 = vmatprep.subr.mxu0 %v1182_v0 }
 0x45b   :  { %1064 = vmatpush3.msra.mxu0 %v869_v61 }
 0x50c   :  { %v856_v62 = vpop.f32.mrf.mxu0 }
 0x50d   :  { %v860_v63 = vmul.f32 %v856_v62, %v687_v44 }
 0x50e   :  { %v1048_v1 = vpop.f32.mrf.mxu0 }
 0x50f   :  { %1066 = vmatmul.mubr.msk.f32.vlgmr.msra.gmra.mxu0 %vm393_vm2, %v860_v63 }
 0x5cf   :  { %v947_v3 = vpop.f32.mrf.mxu0 }
 0x5d0   :  { %v948_v4 = vadd.f32 %v947_v3, %v877_v2 }
 0x5d1   :  { %v1067_v5 = vpop.f32.mrf.mxu0 }
 0x5d2   :  { %v951_v6 = vmax.f32 %v948_v4, 0.0 }
 0x5d4   :  { %952 = vst [vmem:[%s1350_s5] sm:$0x3] %v951_v6 }
 0x5d5   :  { %959 = vsyncpa [#allocation3], 1 }
 0x5d6   :  { %960 = vsyncpa [#allocation5], 1 }
 0x5d7   :  { %961 = vsyncpa [#allocation8], 1 }

</bundles_post_ra>
